<compile_context>
chip_gen: v6e
topology: v6e:2x2x1
jax: 0.10.0
libtpu: 0.0.40
codegen_flags: <defaults>
</compile_context>

<pallas_src>
import math
import jax
import jax.numpy as jnp
from jax import lax
from jax.experimental import pallas as pl
from jax.experimental.pallas import tpu as pltpu


def _round_up(v, m):
    return (v + m - 1) // m * m


def mlp_kernel(x_ref, w1_ref, b1_ref, w2_ref, b2_ref, o_ref):
    # Layer 1: h = x @ W1^T + b1. Weights keep torch layout [out, in]; contract
    # on the last (lane) dim of both operands -> MXU matmul, f32 accumulate.
    h = lax.dot_general(
        x_ref[...], w1_ref[...],
        dimension_numbers=(((1,), (1,)), ((), ())),
        preferred_element_type=jnp.float32)
    h = h + b1_ref[...]                      # f32 bias add, broadcasts over batch

    # Layer 2: out = h @ W2^T + b2. Intermediate re-cast to the weight dtype
    # (bf16) to feed the MXU; accumulation and bias add stay in f32.
    out = lax.dot_general(
        h.astype(w2_ref.dtype), w2_ref[...],
        dimension_numbers=(((1,), (1,)), ((), ())),
        preferred_element_type=jnp.float32)
    out = out + b2_ref[...]
    o_ref[...] = out.astype(o_ref.dtype)


def mlp_forward(x, w1, b1, w2, b2, *, block_m=256, compute_dtype=jnp.bfloat16):
    """Pallas equivalent of MLP.forward: F.linear(F.linear(x, w1, b1), w2, b2).

    x  : [B, n_input]
    w1 : [n_hidden, n_input]   b1 : [n_hidden]
    w2 : [n_output, n_hidden]  b2 : [n_output]
    returns [B, n_output] in x.dtype
    """
    B, n_input = x.shape
    n_hidden = w1.shape[0]
    n_output = w2.shape[0]
    out_dtype = x.dtype

    # Lane-dense padding of feature dims to multiples of 128; batch tile is a
    # multiple of 8 sublanes (capped at block_m), batch padded to a tile multiple.
    kp = _round_up(n_input, 128)
    hp = _round_up(n_hidden, 128)
    np_ = _round_up(n_output, 128)
    tm = min(block_m, _round_up(B, 8))
    bp = _round_up(B, tm)

    cdt = jnp.dtype(compute_dtype)
    xd = jnp.pad(x, ((0, bp - B), (0, kp - n_input))).astype(compute_dtype)
    w1p = jnp.pad(w1, ((0, hp - n_hidden), (0, kp - n_input))).astype(compute_dtype)
    w2p = jnp.pad(w2, ((0, np_ - n_output), (0, hp - n_hidden))).astype(compute_dtype)
    b1p = jnp.pad(b1, (0, hp - n_hidden)).astype(jnp.float32).reshape(1, hp)
    b2p = jnp.pad(b2, (0, np_ - n_output)).astype(jnp.float32).reshape(1, np_)

    # VMEM budget: resident weights + biases, double-buffered x/out tiles,
    # plus the f32 intermediate. Clamp to a range safe on v5e/v6e/v7x.
    out_isz = jnp.dtype(out_dtype).itemsize
    vmem_est = ((hp * kp + np_ * hp) * cdt.itemsize          # resident weights
                + (hp + np_) * 4                             # resident biases (f32)
                + 2 * tm * kp * cdt.itemsize                 # x tile, double-buffered
                + 2 * tm * np_ * out_isz                     # out tile, double-buffered
                + 2 * tm * hp * 4)                           # f32 hidden intermediate
    vmem_limit = int(min(max(2 * vmem_est, 32 * 1024 * 1024), 48 * 1024 * 1024))

    flops = 2 * bp * kp * hp + 2 * bp * hp * np_
    bytes_accessed = (xd.size * cdt.itemsize
                      + w1p.size * cdt.itemsize + w2p.size * cdt.itemsize
                      + b1p.size * 4 + b2p.size * 4
                      + bp * np_ * out_isz)

    grid = (bp // tm,)
    out_padded = pl.pallas_call(
        mlp_kernel,
        out_shape=jax.ShapeDtypeStruct((bp, np_), out_dtype),
        grid=grid,
        in_specs=[
            pl.BlockSpec((tm, kp), lambda i: (i, 0)),     # x tile (pipelined)
            pl.BlockSpec((hp, kp), lambda i: (0, 0)),     # w1 resident
            pl.BlockSpec((1, hp), lambda i: (0, 0)),      # b1 resident
            pl.BlockSpec((np_, hp), lambda i: (0, 0)),    # w2 resident
            pl.BlockSpec((1, np_), lambda i: (0, 0)),     # b2 resident
        ],
        out_specs=pl.BlockSpec((tm, np_), lambda i: (i, 0)),
        compiler_params=pltpu.CompilerParams(
            dimension_semantics=("parallel",),
            vmem_limit_bytes=vmem_limit),
        cost_estimate=pl.CostEstimate(
            flops=flops, transcendentals=0, bytes_accessed=bytes_accessed),
    )(xd, w1p, b1p, w2p, b2p)

    # Strip batch/feature padding outside the kernel (keeps the store lane-dense).
    return out_padded[:B, :n_output]


def init_mlp_params(key, n_input, n_hidden, n_output, dtype=jnp.float32):
    """Deterministic init matching MLP.init(): uniform(-stdv, stdv), stdv=1/sqrt(n_hidden)."""
    stdv = 1.0 / math.sqrt(n_hidden)
    k1, k2, k3, k4 = jax.random.split(key, 4)
    w1 = jax.random.uniform(k1, (n_hidden, n_input), dtype, -stdv, stdv)
    b1 = jax.random.uniform(k2, (n_hidden,), dtype, -stdv, stdv)
    w2 = jax.random.uniform(k3, (n_output, n_hidden), dtype, -stdv, stdv)
    b2 = jax.random.uniform(k4, (n_output,), dtype, -stdv, stdv)
    return w1, b1, w2, b2


if __name__ == "__main__":
    key = jax.random.PRNGKey(0)
    B, n_input, n_hidden, n_output = 8, 16, 32, 8

    kx, kp = jax.random.split(key)
    x = jax.random.normal(kx, (B, n_input), jnp.float32)
    w1, b1, w2, b2 = init_mlp_params(kp, n_input, n_hidden, n_output)

    out = mlp_forward(x, w1, b1, w2, b2)
    out = jax.block_until_ready(out)

    # Pure-JAX f32 reference (same semantics as the torch F.linear chain).
    ref = (x @ w1.T + b1) @ w2.T + b2
    assert out.shape == (B, n_output)
    # bf16 MXU inputs with f32 accumulation -> loosened tolerance vs f32 reference.
    assert jnp.allclose(out, ref, atol=5e-2, rtol=5e-2), "mismatch vs reference"

    print("KERNEL_OK")
</pallas_src>

<mosaic_0001>
module attributes {stable_mosaic.version = 11 : i64} {
  func.func @mlp_kernel(%arg0: i32, %arg1: memref<8x128xbf16, #tpu.memory_space<vmem>>, %arg2: memref<128x128xbf16, #tpu.memory_space<vmem>>, %arg3: memref<1x128xf32, #tpu.memory_space<vmem>>, %arg4: memref<128x128xbf16, #tpu.memory_space<vmem>>, %arg5: memref<1x128xf32, #tpu.memory_space<vmem>>, %arg6: memref<8x128xf32, #tpu.memory_space<vmem>>) attributes {dimension_semantics = [#tpu.dimension_semantics<parallel>], iteration_bounds = array<i64: 1>, scalar_prefetch = 0 : i64, scratch_operands = 0 : i64, tpu.core_type = #tpu.core_type<tc>, window_params = [{transform_indices = @transform_0, window_bounds = array<i64: 8, 128>}, {pipeline_mode = #tpu.pipeline_mode<synchronous>, transform_indices = @transform_1, window_bounds = array<i64: 128, 128>}, {pipeline_mode = #tpu.pipeline_mode<synchronous>, transform_indices = @transform_2, window_bounds = array<i64: 1, 128>}, {pipeline_mode = #tpu.pipeline_mode<synchronous>, transform_indices = @transform_3, window_bounds = array<i64: 128, 128>}, {pipeline_mode = #tpu.pipeline_mode<synchronous>, transform_indices = @transform_4, window_bounds = array<i64: 1, 128>}, {transform_indices = @transform_5, window_bounds = array<i64: 8, 128>}]} {
    %c0 = arith.constant 0 : index
    %c0_0 = arith.constant 0 : index
    %0 = vector.load %arg1[%c0, %c0_0] : memref<8x128xbf16, #tpu.memory_space<vmem>>, vector<8x128xbf16>
    %c0_1 = arith.constant 0 : index
    %c0_2 = arith.constant 0 : index
    %1 = vector.load %arg2[%c0_1, %c0_2] : memref<128x128xbf16, #tpu.memory_space<vmem>>, vector<128x128xbf16>
    %cst = arith.constant dense<0.000000e+00> : vector<8x128xf32>
    %2 = tpu.matmul %0, %1, %cst {dimension_numbers = #tpu.dot_dimension_numbers<[1], [1], [0], [0], [0, 0, 1, 0], [], []>} : vector<8x128xbf16>, vector<128x128xbf16>, vector<8x128xf32> -> vector<8x128xf32>
    %c0_3 = arith.constant 0 : index
    %c0_4 = arith.constant 0 : index
    %3 = vector.load %arg3[%c0_3, %c0_4] : memref<1x128xf32, #tpu.memory_space<vmem>>, vector<1x128xf32>
    %4 = vector.broadcast %3 : vector<1x128xf32> to vector<8x128xf32>
    %5 = arith.addf %2, %4 : vector<8x128xf32>
    %6 = arith.truncf %5 : vector<8x128xf32> to vector<8x128xbf16>
    %c0_5 = arith.constant 0 : index
    %c0_6 = arith.constant 0 : index
    %7 = vector.load %arg4[%c0_5, %c0_6] : memref<128x128xbf16, #tpu.memory_space<vmem>>, vector<128x128xbf16>
    %cst_7 = arith.constant dense<0.000000e+00> : vector<8x128xf32>
    %8 = tpu.matmul %6, %7, %cst_7 {dimension_numbers = #tpu.dot_dimension_numbers<[1], [1], [0], [0], [0, 0, 1, 0], [], []>} : vector<8x128xbf16>, vector<128x128xbf16>, vector<8x128xf32> -> vector<8x128xf32>
    %c0_8 = arith.constant 0 : index
    %c0_9 = arith.constant 0 : index
    %9 = vector.load %arg5[%c0_8, %c0_9] : memref<1x128xf32, #tpu.memory_space<vmem>>, vector<1x128xf32>
    %10 = vector.broadcast %9 : vector<1x128xf32> to vector<8x128xf32>
    %11 = arith.addf %8, %10 : vector<8x128xf32>
    %c0_10 = arith.constant 0 : index
    %c0_11 = arith.constant 0 : index
    %12 = vector.load %arg6[%c0_10, %c0_11] : memref<8x128xf32, #tpu.memory_space<vmem>>, vector<8x128xf32>
    tpu.vector_store %arg6[%c0_10, %c0_11], %11 {strides = array<i32>} : memref<8x128xf32, #tpu.memory_space<vmem>>, vector<8x128xf32>,
    return
  }
  func.func @transform_0(%arg0: i32) -> (i32, i32) {
    %c0_i32 = arith.constant 0 : i32
    %c0_i32_0 = arith.constant 0 : i32
    return %arg0, %c0_i32 : i32, i32
  }
  func.func @transform_1(%arg0: i32) -> (i32, i32) {
    %c0_i32 = arith.constant 0 : i32
    %c0_i32_0 = arith.constant 0 : i32
    %c0_i32_1 = arith.constant 0 : i32
    return %c0_i32, %c0_i32_0 : i32, i32
  }
  func.func @transform_2(%arg0: i32) -> (i32, i32) {
    %c0_i32 = arith.constant 0 : i32
    %c0_i32_0 = arith.constant 0 : i32
    %c0_i32_1 = arith.constant 0 : i32
    return %c0_i32, %c0_i32_0 : i32, i32
  }
  func.func @transform_3(%arg0: i32) -> (i32, i32) {
    %c0_i32 = arith.constant 0 : i32
    %c0_i32_0 = arith.constant 0 : i32
    %c0_i32_1 = arith.constant 0 : i32
    return %c0_i32, %c0_i32_0 : i32, i32
  }
  func.func @transform_4(%arg0: i32) -> (i32, i32) {
    %c0_i32 = arith.constant 0 : i32
    %c0_i32_0 = arith.constant 0 : i32
    %c0_i32_1 = arith.constant 0 : i32
    return %c0_i32, %c0_i32_0 : i32, i32
  }
  func.func @transform_5(%arg0: i32) -> (i32, i32) {
    %c0_i32 = arith.constant 0 : i32
    %c0_i32_0 = arith.constant 0 : i32
    return %arg0, %c0_i32 : i32, i32
  }
}

</mosaic_0001>

<bundles_post_ra>
// kernel: tpu_custom_call.1
= control target key start
LH: loop header
LB: loop body
LE: loop exit
PB: predicated region body
PF: predicated region fallthrough
CT: control target
= control target key end

     0   :  { %10 = vsyncpa [#allocation3], 0  ;;  %s544_s0 = inlined_call_operand.hbm [shape: bf16[8,128], index: 0, kind: input, shape index: {}]   ;;  %s545_s1 = inlined_call_operand.hbm [shape: bf16[128,128], index: 1, kind: input, shape index: {}]   ;;  %s546_s2 = inlined_call_operand.vmem [shape: f32[1,128], index: 2, kind: input, shape index: {}]   ;;  %s547_s3 = inlined_call_operand.hbm [shape: bf16[128,128], index: 3, kind: input, shape index: {}]   ;;  %s548_s4 = inlined_call_operand.vmem [shape: f32[1,128], index: 4, kind: input, shape index: {}]   ;;  %s549_s5 = inlined_call_operand.hbm [shape: f32[8,128], index: 5, kind: output, shape index: {}]  }
   0x1   :  { %11 = vsyncpa [#allocation6], 0 }
   0x2   :  { %12 = vsyncpa [#allocation4], 0  ;;  %s488_s18 = smov [#allocation5]  }
   0x3   :  { %s28_s19 = sshll.u32 %s488_s18, 4  ;;  %s29_s19 = int_to_ptr.vmem [resolvable:$true] %s28_s19 }
   0x4   :  { %s410_s20 = scalar_lea.vmem %s29_s19, 1024  ;;  %p415_p1 = scmp.lt.s32.totalorder %s29_s19, %s29_s19 }
   0x5   :  { %p411_p0 = scmp.ne.s32.totalorder %s29_s19, %s410_s20  ;;  %p416_p2 = scmp.lt.s32.totalorder %s410_s20, %s410_s20 }
   0x7   :  { %p417_p3 = por %p416_p2, %p415_p1 }
   0x9   :  { %p418_p4 = pnand %p417_p3, %p411_p0 }
   0xb   :  { %421 = shalt.err (!%p418_p4)
}
   0xc   :  { %s489_s21 = smov 64   ;;  %s490_s22 = smov 4  }
   0xd   :  { %34 = dma.hbm_to_vmem [thread:$0]  %s545_s1, 1024, %s29_s19, [#allocation6], %s489_s21, %s489_s21, %s490_s22  }
   0xe   :  { %s491_s25 = smov [#allocation2]   ;;  %s492_s27 = smov [#allocation7]  }
   0xf   :  { %s19_s26 = sshll.u32 %s491_s25, 4  ;;  %s42_s28 = sshll.u32 %s492_s27, 4  ;;  %s20_s26 = int_to_ptr.vmem [resolvable:$true] %s19_s26  ;;  %s43_s28 = int_to_ptr.vmem [resolvable:$true] %s42_s28 }
  0x10   :  { %s430_s29 = scalar_lea.vmem %s20_s26, 64  ;;  %p435_p6 = scmp.lt.s32.totalorder %s20_s26, %s20_s26 }
  0x11   :  { %p431_p5 = scmp.ne.s32.totalorder %s20_s26, %s430_s29  ;;  %p436_p7 = scmp.lt.s32.totalorder %s430_s29, %s430_s29 }
  0x13   :  { %p437_p8 = por %p436_p7, %p435_p6 }
  0x15   :  { %p438_p9 = pnand %p437_p8, %p431_p5 }
  0x17   :  { %441 = shalt.err (!%p438_p9)
}
  0x18   :  { %22 = dma.hbm_to_vmem [thread:$0]  %s544_s0, 64, %s20_s26, [#allocation3]  }
  0x19   :  { %s450_s7 = scalar_lea.vmem %s43_s28, 1024  ;;  %p455_p11 = scmp.lt.s32.totalorder %s43_s28, %s43_s28 }
  0x1a   :  { %p451_p10 = scmp.ne.s32.totalorder %s43_s28, %s450_s7  ;;  %p456_p12 = scmp.lt.s32.totalorder %s450_s7, %s450_s7 }
  0x1c   :  { %p457_p13 = por %p456_p12, %p455_p11 }
  0x1e   :  { %p458_p0 = pnand %p457_p13, %p451_p10 }
  0x20   :  { %461 = shalt.err (!%p458_p0)
}
  0x21   :  { %48 = dma.hbm_to_vmem [thread:$0]  %s547_s3, 1024, %s43_s28, [#allocation6], %s489_s21, %s489_s21, %s490_s22  }
  0x22   :  { %482 = dma.done.wait [#allocation3], 64  }
  0x23   :  { %483 = vsyncadd [#allocation3], 4294967232 }
  0x24   :  { %484 = dma.done.wait [#allocation6], 2048  }
  0x25   :  { %485 = vsyncadd [#allocation6], 4294965248  ;;  %v493_v0 = vmov 0.0   ;;  %vm494_vm0 = vmmov 0   ;;  %v386_v1 = vld [vmem:[#allocation5 + $0x38] sm:$0xff]   ;;  %v387_v2 = vld [vmem:[#allocation5 + $0x30] sm:$0xff]  }
  0x26   :  { %338 = vmatprep.subr.bf16.mxu0 %v493_v0  ;;  %354 = vmatprep.mubr.msk.bf16.mxu0 %vm494_vm0, %v493_v0  ;;  %v394_v3 = vld [vmem:[#allocation7 + $0x38] sm:$0xff]   ;;  %v388_v4 = vld [vmem:[#allocation5 + $0x28] sm:$0xff]   ;;  %v395_v5 = vld [vmem:[#allocation7 + $0x30] sm:$0xff]   ;;  %s495_s11 = smov [#allocation8]  }
  0x27   :  { %358 = vmatprep.subr.bf16.mxu1 %v493_v0  ;;  %374 = vmatprep.mubr.msk.bf16.mxu1 %vm494_vm0, %v493_v0  ;;  %v389_v6 = vld [vmem:[#allocation5 + $0x20] sm:$0xff]   ;;  %v396_v7 = vld [vmem:[#allocation7 + $0x28] sm:$0xff]   ;;  %v390_v8 = vld [vmem:[#allocation5 + $0x18] sm:$0xff]   ;;  %s292_s12 = sshll.u32 %s495_s11, 4  ;;  %s293_s12 = int_to_ptr.vmem [resolvable:$true] %s292_s12 }
  0x28   :  { %339 = vmatpush3.bf16.xpose.msra.mxu0 %v386_v1  ;;  %359 = vmatpush3.bf16.xpose.msra.mxu1 %v394_v3  ;;  %v397_v9 = vld [vmem:[#allocation7 + $0x20] sm:$0xff]   ;;  %v391_v10 = vld [vmem:[#allocation5 + $0x10] sm:$0xff]   ;;  %v398_v11 = vld [vmem:[#allocation7 + $0x18] sm:$0xff]   ;;  %p467_p2 = scmp.lt.s32.totalorder %s293_s12, %s293_s12 }
  0x29   :  { %340 = vmatprep.subr.bf16.mxu0 %v493_v0  ;;  %360 = vmatprep.subr.bf16.mxu1 %v493_v0  ;;  %v392_v12 = vld [vmem:[#allocation5 + $0x8] sm:$0xff]   ;;  %v399_v13 = vld [vmem:[#allocation7 + $0x10] sm:$0xff]   ;;  %v393_v14 = vld [vmem:[#allocation5] sm:$0xff]  }
  0x2a   :  { %v400_v15 = vld [vmem:[#allocation7 + $0x8] sm:$0xff]   ;;  %v61_v16 = vld [vmem:[#allocation2] sm:$0xf]  ;;  %v401_v17 = vld [vmem:[#allocation7] sm:$0xff]  }
  0x2b   :  { %v302_v18 = vld [vmem:[%s546_s2] ss:$0 sm:$0xff]  ;;  %s462_s2 = scalar_lea.vmem %s293_s12, 128 }
  0x2c   :  { %v311_v25 = vld [vmem:[%s548_s4] ss:$0 sm:$0xff]  ;;  %p463_p1 = scmp.ne.s32.totalorder %s293_s12, %s462_s2  ;;  %p468_p3 = scmp.lt.s32.totalorder %s462_s2, %s462_s2 }
  0x2e   :  { %p469_p4 = por %p468_p3, %p467_p2 }
  0x30   :  { %341 = vmatpush3.bf16.xpose.msra.mxu0 %v387_v2  ;;  %361 = vmatpush3.bf16.xpose.msra.mxu1 %v395_v5  ;;  %p470_p5 = pnand %p469_p4, %p463_p1 }
  0x31   :  { %342 = vmatprep.subr.bf16.mxu0 %v493_v0  ;;  %362 = vmatprep.subr.bf16.mxu1 %v493_v0 }
  0x38   :  { %343 = vmatpush3.bf16.xpose.msra.mxu0 %v388_v4  ;;  %363 = vmatpush3.bf16.xpose.msra.mxu1 %v396_v7 }
  0x39   :  { %344 = vmatprep.subr.bf16.mxu0 %v493_v0  ;;  %364 = vmatprep.subr.bf16.mxu1 %v493_v0 }
  0x40   :  { %345 = vmatpush3.bf16.xpose.msra.mxu0 %v389_v6  ;;  %365 = vmatpush3.bf16.xpose.msra.mxu1 %v397_v9 }
  0x41   :  { %346 = vmatprep.subr.bf16.mxu0 %v493_v0  ;;  %366 = vmatprep.subr.bf16.mxu1 %v493_v0 }
  0x48   :  { %347 = vmatpush3.bf16.xpose.msra.mxu0 %v390_v8  ;;  %367 = vmatpush3.bf16.xpose.msra.mxu1 %v398_v11 }
  0x49   :  { %348 = vmatprep.subr.bf16.mxu0 %v493_v0  ;;  %368 = vmatprep.subr.bf16.mxu1 %v493_v0 }
  0x50   :  { %349 = vmatpush3.bf16.xpose.msra.mxu0 %v391_v10  ;;  %369 = vmatpush3.bf16.xpose.msra.mxu1 %v399_v13 }
  0x51   :  { %350 = vmatprep.subr.bf16.mxu0 %v493_v0  ;;  %370 = vmatprep.subr.bf16.mxu1 %v493_v0 }
  0x58   :  { %351 = vmatpush3.bf16.xpose.msra.mxu0 %v392_v12  ;;  %371 = vmatpush3.bf16.xpose.msra.mxu1 %v400_v15 }
  0x59   :  { %352 = vmatprep.subr.bf16.mxu0 %v493_v0  ;;  %372 = vmatprep.subr.bf16.mxu1 %v493_v0 }
  0x60   :  { %353 = vmatpush3.bf16.xpose.msra.mxu0 %v393_v14  ;;  %373 = vmatpush3.bf16.xpose.msra.mxu1 %v401_v17 }
  0x67   :  { %355 = vmatmul.mubr.bf16.vlgmr.msra.gmra.mxu0 %v61_v16 }
 0x127   :  { %v167_v19 = vpop.f32.mrf.mxu0 }
 0x128   :  { %v168_v20 = vadd.f32 %v302_v18, %v167_v19 }
 0x129   :  { %v356_v21 = vpop.f32.mrf.mxu0 }
 0x12a   :  { %v173_v22 = vpack.c.bf16 %v168_v20, %v168_v20 }
 0x12b   :  { %v170_v23 = vpop.f32.mrf.mxu0 }
 0x12c   :  { %375 = vmatmul.mubr.bf16.vlgmr.msra.gmra.mxu1 %v173_v22 }
 0x12d   :  { %v357_v24 = vpop.f32.mrf.mxu0 }
 0x1ec   :  { %v279_v26 = vpop.f32.mrf.mxu1 }
 0x1ed   :  { %v280_v27 = vadd.f32 %v311_v25, %v279_v26 }
 0x1ee   :  { %v376_v28 = vpop.f32.mrf.mxu1 }
 0x1ef   :  { %285 = vst [vmem:[#allocation8] sm:$0xff] %v280_v27 }
 0x1f0   :  { %v282_v29 = vpop.f32.mrf.mxu1 }
 0x1f1   :  { %473 = shalt.err (!%p470_p5)
}
 0x1f2   :  { %295 = dma.vmem_to_hbm [thread:$0]  %s293_s12, 128, %s549_s5, [#allocation4]   ;;  %v377_v30 = vpop.f32.mrf.mxu1 }
 0x1f3   :  { %486 = dma.done.wait [#allocation4], 128  }
 0x1f4   :  { %487 = vsyncadd [#allocation4], 4294967168 }
 0x1f5   :  { %299 = vsyncpa [#allocation3], 1 }
 0x1f6   :  { %300 = vsyncpa [#allocation6], 1 }
 0x1f7   :  { %301 = vsyncpa [#allocation4], 1 }

</bundles_post_ra>
